<compile_context>
chip_gen: v7x
topology: tpu7x:2x2x1
jax: 0.10.0
libtpu: 0.0.40
codegen_flags: <defaults>
</compile_context>

<pallas_src>
import jax
import jax.numpy as jnp
from jax.experimental import pallas as pl
from jax.experimental.pallas import tpu as pltpu


LANE = 128  # only *hidden* feature dims (which never touch HBM) are padded to this


def _round_up(n: int, m: int) -> int:
    return ((n + m - 1) // m) * m


# ----------------------------------------------------------------------------
# Pallas kernel: fused 3-layer MLP forward for one batch tile.
# Weights are stored (in_features, out_features); biases are (1, out_features).
# action_scale/action_bias are already folded into w2/b2.
# ----------------------------------------------------------------------------
def _actor_kernel(x_ref, w0_ref, b0_ref, w1_ref, b1_ref, w2_ref, b2_ref, o_ref):
    cdt = w0_ref.dtype  # compute dtype feeding the MXU (f32 or bf16)

    x = x_ref[...]

    # linear0 + ReLU (bias add / ReLU stay in f32 on the VPU)
    h = jnp.dot(x.astype(cdt), w0_ref[...],
                preferred_element_type=jnp.float32) + b0_ref[...]
    h = jnp.maximum(h, 0.0)

    # linear1 + ReLU
    h = jnp.dot(h.astype(cdt), w1_ref[...],
                preferred_element_type=jnp.float32) + b1_ref[...]
    h = jnp.maximum(h, 0.0)

    # linear2 (action scale/bias already folded into w2/b2)
    o_ref[...] = jnp.dot(h.astype(cdt), w2_ref[...],
                         preferred_element_type=jnp.float32) + b2_ref[...]


# ----------------------------------------------------------------------------
# Wrapper: batch-tiled pallas_call
# ----------------------------------------------------------------------------
def deterministic_actor_forward(x, prepared, *, tile_b_max=1024):
    """x: (B, state_dim) float array. prepared: params from prepare_actor_params."""
    B, state_dim = x.shape
    w0, b0 = prepared["w0"], prepared["b0"]
    w1, b1 = prepared["w1"], prepared["b1"]
    w2, b2 = prepared["w2"], prepared["b2"]
    assert w0.shape[0] == state_dim, "state_dim mismatch with prepared params"
    h0 = w0.shape[1]
    h1 = w1.shape[1]
    act_dim = w2.shape[1]

    # Batch tile: as big as possible (per-grid-step overhead ~0.35us), sublane
    # aligned, and split so the grid has >=2 steps when there is enough work
    # (both v7x TensorCores get a tile under "parallel" semantics).
    tile_b = max(8, min(tile_b_max, _round_up((B + 1) // 2, 8)))
    b_pad = _round_up(B, tile_b)
    grid = (b_pad // tile_b,)

    x = x.astype(jnp.float32)
    if b_pad != B:  # skip the pad entirely when tile_b divides B
        x = jnp.pad(x, ((0, b_pad - B), (0, 0)))

    const2d = lambda i: (0, 0)  # same block every step -> stays resident in VMEM

    def wspec(shape):
        # Constant-index weights/biases: single-buffer them (they never change).
        return pl.BlockSpec(shape, const2d, pipeline_mode=pl.Buffered(1))

    # Advisory cost so XLA can schedule/overlap this tiny custom call.
    flops = 2 * b_pad * (state_dim * h0 + h0 * h1 + h1 * act_dim)
    param_bytes = sum(int(v.size) * v.dtype.itemsize for v in prepared.values())
    cost = pl.CostEstimate(
        flops=int(flops),
        transcendentals=0,
        bytes_accessed=int(4 * b_pad * (state_dim + act_dim) + param_bytes),
    )

    out = pl.pallas_call(
        _actor_kernel,
        out_shape=jax.ShapeDtypeStruct((b_pad, act_dim), jnp.float32),
        grid=grid,
        in_specs=[
            # x keeps its real (narrow) state dim: block last dim == full array dim.
            pl.BlockSpec((tile_b, state_dim), lambda i: (i, 0)),
            wspec((state_dim, h0)),   # w0 (true K, padded hidden out)
            wspec((1, h0)),           # b0
            wspec((h0, h1)),          # w1
            wspec((1, h1)),           # b1
            wspec((h1, act_dim)),     # w2 (scale folded; true action_dim out)
            wspec((1, act_dim)),      # b2 (scale/bias folded)
        ],
        # Output emitted at its real width: no 128-lane pad, no post-slice readback.
        out_specs=pl.BlockSpec((tile_b, act_dim), lambda i: (i, 0)),
        compiler_params=pltpu.CompilerParams(
            dimension_semantics=("parallel",),  # shard batch tiles across TCs (v7x)
        ),
        cost_estimate=cost,
    )(x, w0, b0, w1, b1, w2, b2)

    return out if b_pad == B else out[:B]


# ----------------------------------------------------------------------------
# Parameter init (torch-style orthogonal_ weights, zeros_ biases) + prep
# ----------------------------------------------------------------------------
def _orthogonal(key, out_features, in_features, gain=1.0, dtype=jnp.float32):
    """Mimics torch.nn.init.orthogonal_ on a (out, in) weight; returns (in, out)."""
    rows, cols = out_features, in_features
    flat = jax.random.normal(key, (rows, cols), dtype=jnp.float32)
    if rows < cols:
        flat = flat.T
    q, r = jnp.linalg.qr(flat)
    d = jnp.sign(jnp.diagonal(r))
    d = jnp.where(d == 0, 1.0, d)   # guard the (measure-zero) zero-diagonal case
    q = q * d[None, :]
    if rows < cols:
        q = q.T
    w_torch = gain * q                      # (out, in), like nn.Linear.weight
    return jnp.asarray(w_torch.T, dtype)    # stored (in, out) for x @ W


def init_actor_params(key, state_dim, action_dim, hidden_units=(64, 64)):
    dims = [state_dim, *hidden_units, action_dim]
    keys = jax.random.split(key, len(dims) - 1)
    params = {}
    for i in range(len(dims) - 1):
        in_f, out_f = dims[i], dims[i + 1]
        params[f"w{i}"] = _orthogonal(keys[i], out_f, in_f)
        params[f"b{i}"] = jnp.zeros((1, out_f), jnp.float32)
    return params


def prepare_actor_params(params, action_scale=1.0, action_bias=0.0, *,
                         compute_dtype=jnp.float32, lane=LANE):
    """Fold the action affine into the last layer, pad only *internal* (hidden)
    feature dims to a multiple of `lane`, and cast weights to compute_dtype
    (bf16 is a valid fast path on v5e/v6e/v7x; the MXU is bf16-native on all of
    them).  Biases stay f32 (bias add / ReLU / accumulation run in f32).
    The network input dim (state) and output dim (action) keep their true
    sizes so x / out stay narrow in HBM."""
    n_layers = len(params) // 2
    prepared = {}
    for i in range(n_layers):
        w = params[f"w{i}"]   # (in, out)
        b = params[f"b{i}"]   # (1, out)
        if i == n_layers - 1:
            w = w * action_scale
            b = b * action_scale + action_bias
        in_f, out_f = w.shape
        in_p = in_f if i == 0 else _round_up(in_f, lane)
        out_p = out_f if i == n_layers - 1 else _round_up(out_f, lane)
        w = jnp.pad(w, ((0, in_p - in_f), (0, out_p - out_f)))
        b = jnp.pad(b, ((0, 0), (0, out_p - out_f)))
        prepared[f"w{i}"] = w.astype(compute_dtype)
        prepared[f"b{i}"] = b.astype(jnp.float32)
    return prepared


# ----------------------------------------------------------------------------
# Pure-JAX reference (unpadded, f32)
# ----------------------------------------------------------------------------
def _ref_forward(x, params, action_scale, action_bias):
    h = jnp.maximum(x @ params["w0"] + params["b0"], 0.0)
    h = jnp.maximum(h @ params["w1"] + params["b1"], 0.0)
    out = h @ params["w2"] + params["b2"]
    return action_scale * out + action_bias


if __name__ == "__main__":
    key = jax.random.PRNGKey(0)
    k_param, k_x = jax.random.split(key)

    batch, state_dim, action_dim = 4, 16, 8
    hidden_units = (64, 64)
    action_scale, action_bias = 2.0, 0.5

    params = init_actor_params(k_param, state_dim, action_dim, hidden_units)
    x = jax.random.normal(k_x, (batch, state_dim), dtype=jnp.float32)

    ref = _ref_forward(x, params, action_scale, action_bias)

    # f32 weights (tolerance allows for MXU f32-via-bf16-pass default precision).
    prep_f32 = prepare_actor_params(params, action_scale, action_bias,
                                    compute_dtype=jnp.float32)
    out_f32 = jax.block_until_ready(deterministic_actor_forward(x, prep_f32))
    assert out_f32.shape == (batch, action_dim)
    assert jnp.allclose(out_f32, ref, atol=2e-2, rtol=1e-2), "f32 mismatch vs reference"

    # bf16 weights (fast MXU path on v5e/v6e/v7x; f32 accumulation): loose check.
    prep_bf16 = prepare_actor_params(params, action_scale, action_bias,
                                     compute_dtype=jnp.bfloat16)
    out_bf16 = jax.block_until_ready(deterministic_actor_forward(x, prep_bf16))
    assert out_bf16.shape == (batch, action_dim)
    assert jnp.allclose(out_bf16, ref, atol=1.5e-1, rtol=5e-2), "bf16 mismatch vs reference"

    print("KERNEL_OK")
</pallas_src>

<mosaic_0001>
module attributes {stable_mosaic.version = 11 : i64} {
  func.func @_actor_kernel(%arg0: i32, %arg1: memref<8x16xf32, #tpu.memory_space<vmem>>, %arg2: memref<16x128xf32, #tpu.memory_space<vmem>>, %arg3: memref<1x128xf32, #tpu.memory_space<vmem>>, %arg4: memref<128x128xf32, #tpu.memory_space<vmem>>, %arg5: memref<1x128xf32, #tpu.memory_space<vmem>>, %arg6: memref<128x8xf32, #tpu.memory_space<vmem>>, %arg7: memref<1x8xf32, #tpu.memory_space<vmem>>, %arg8: memref<8x8xf32, #tpu.memory_space<vmem>>) attributes {dimension_semantics = [#tpu.dimension_semantics<parallel>], iteration_bounds = array<i64: 1>, scalar_prefetch = 0 : i64, scratch_operands = 0 : i64, tpu.core_type = #tpu.core_type<tc>, window_params = [{transform_indices = @transform_0, window_bounds = array<i64: 8, 16>}, {pipeline_mode = #tpu.pipeline_mode<synchronous>, transform_indices = @transform_1, window_bounds = array<i64: 16, 128>}, {pipeline_mode = #tpu.pipeline_mode<synchronous>, transform_indices = @transform_2, window_bounds = array<i64: 1, 128>}, {pipeline_mode = #tpu.pipeline_mode<synchronous>, transform_indices = @transform_3, window_bounds = array<i64: 128, 128>}, {pipeline_mode = #tpu.pipeline_mode<synchronous>, transform_indices = @transform_4, window_bounds = array<i64: 1, 128>}, {pipeline_mode = #tpu.pipeline_mode<synchronous>, transform_indices = @transform_5, window_bounds = array<i64: 128, 8>}, {pipeline_mode = #tpu.pipeline_mode<synchronous>, transform_indices = @transform_6, window_bounds = array<i64: 1, 8>}, {transform_indices = @transform_7, window_bounds = array<i64: 8, 8>}]} {
    %c0 = arith.constant 0 : index
    %c0_0 = arith.constant 0 : index
    %0 = vector.load %arg1[%c0, %c0_0] : memref<8x16xf32, #tpu.memory_space<vmem>>, vector<8x16xf32>
    %c0_1 = arith.constant 0 : index
    %c0_2 = arith.constant 0 : index
    %1 = vector.load %arg2[%c0_1, %c0_2] : memref<16x128xf32, #tpu.memory_space<vmem>>, vector<16x128xf32>
    %cst = arith.constant dense<0.000000e+00> : vector<8x128xf32>
    %2 = tpu.matmul %0, %1, %cst {dimension_numbers = #tpu.dot_dimension_numbers<[1], [0], [0], [1], [0, 0, 1, 1], [], []>} : vector<8x16xf32>, vector<16x128xf32>, vector<8x128xf32> -> vector<8x128xf32>
    %c0_3 = arith.constant 0 : index
    %c0_4 = arith.constant 0 : index
    %3 = vector.load %arg3[%c0_3, %c0_4] : memref<1x128xf32, #tpu.memory_space<vmem>>, vector<1x128xf32>
    %4 = vector.broadcast %3 : vector<1x128xf32> to vector<8x128xf32>
    %5 = arith.addf %2, %4 : vector<8x128xf32>
    %cst_5 = arith.constant 0.000000e+00 : f32
    %6 = vector.broadcast %cst_5 : f32 to vector<8x128xf32>
    %7 = arith.maximumf %5, %6 : vector<8x128xf32>
    %c0_6 = arith.constant 0 : index
    %c0_7 = arith.constant 0 : index
    %8 = vector.load %arg4[%c0_6, %c0_7] : memref<128x128xf32, #tpu.memory_space<vmem>>, vector<128x128xf32>
    %cst_8 = arith.constant dense<0.000000e+00> : vector<8x128xf32>
    %9 = tpu.matmul %7, %8, %cst_8 {dimension_numbers = #tpu.dot_dimension_numbers<[1], [0], [0], [1], [0, 0, 1, 1], [], []>} : vector<8x128xf32>, vector<128x128xf32>, vector<8x128xf32> -> vector<8x128xf32>
    %c0_9 = arith.constant 0 : index
    %c0_10 = arith.constant 0 : index
    %10 = vector.load %arg5[%c0_9, %c0_10] : memref<1x128xf32, #tpu.memory_space<vmem>>, vector<1x128xf32>
    %11 = vector.broadcast %10 : vector<1x128xf32> to vector<8x128xf32>
    %12 = arith.addf %9, %11 : vector<8x128xf32>
    %cst_11 = arith.constant 0.000000e+00 : f32
    %13 = vector.broadcast %cst_11 : f32 to vector<8x128xf32>
    %14 = arith.maximumf %12, %13 : vector<8x128xf32>
    %c0_12 = arith.constant 0 : index
    %c0_13 = arith.constant 0 : index
    %15 = vector.load %arg6[%c0_12, %c0_13] : memref<128x8xf32, #tpu.memory_space<vmem>>, vector<128x8xf32>
    %cst_14 = arith.constant dense<0.000000e+00> : vector<8x8xf32>
    %16 = tpu.matmul %14, %15, %cst_14 {dimension_numbers = #tpu.dot_dimension_numbers<[1], [0], [0], [1], [0, 0, 1, 1], [], []>} : vector<8x128xf32>, vector<128x8xf32>, vector<8x8xf32> -> vector<8x8xf32>
    %c0_15 = arith.constant 0 : index
    %c0_16 = arith.constant 0 : index
    %17 = vector.load %arg7[%c0_15, %c0_16] : memref<1x8xf32, #tpu.memory_space<vmem>>, vector<1x8xf32>
    %18 = vector.broadcast %17 : vector<1x8xf32> to vector<8x8xf32>
    %19 = arith.addf %16, %18 : vector<8x8xf32>
    %c0_17 = arith.constant 0 : index
    %c0_18 = arith.constant 0 : index
    %20 = vector.load %arg8[%c0_17, %c0_18] : memref<8x8xf32, #tpu.memory_space<vmem>>, vector<8x8xf32>
    tpu.vector_store %arg8[%c0_17, %c0_18], %19 {strides = array<i32>} : memref<8x8xf32, #tpu.memory_space<vmem>>, vector<8x8xf32>,
    return
  }
  func.func @transform_0(%arg0: i32) -> (i32, i32) {
    %c0_i32 = arith.constant 0 : i32
    %c0_i32_0 = arith.constant 0 : i32
    return %arg0, %c0_i32 : i32, i32
  }
  func.func @transform_1(%arg0: i32) -> (i32, i32) {
    %c0_i32 = arith.constant 0 : i32
    %c0_i32_0 = arith.constant 0 : i32
    %c0_i32_1 = arith.constant 0 : i32
    return %c0_i32, %c0_i32_0 : i32, i32
  }
  func.func @transform_2(%arg0: i32) -> (i32, i32) {
    %c0_i32 = arith.constant 0 : i32
    %c0_i32_0 = arith.constant 0 : i32
    %c0_i32_1 = arith.constant 0 : i32
    return %c0_i32, %c0_i32_0 : i32, i32
  }
  func.func @transform_3(%arg0: i32) -> (i32, i32) {
    %c0_i32 = arith.constant 0 : i32
    %c0_i32_0 = arith.constant 0 : i32
    %c0_i32_1 = arith.constant 0 : i32
    return %c0_i32, %c0_i32_0 : i32, i32
  }
  func.func @transform_4(%arg0: i32) -> (i32, i32) {
    %c0_i32 = arith.constant 0 : i32
    %c0_i32_0 = arith.constant 0 : i32
    %c0_i32_1 = arith.constant 0 : i32
    return %c0_i32, %c0_i32_0 : i32, i32
  }
  func.func @transform_5(%arg0: i32) -> (i32, i32) {
    %c0_i32 = arith.constant 0 : i32
    %c0_i32_0 = arith.constant 0 : i32
    %c0_i32_1 = arith.constant 0 : i32
    return %c0_i32, %c0_i32_0 : i32, i32
  }
  func.func @transform_6(%arg0: i32) -> (i32, i32) {
    %c0_i32 = arith.constant 0 : i32
    %c0_i32_0 = arith.constant 0 : i32
    %c0_i32_1 = arith.constant 0 : i32
    return %c0_i32, %c0_i32_0 : i32, i32
  }
  func.func @transform_7(%arg0: i32) -> (i32, i32) {
    %c0_i32 = arith.constant 0 : i32
    %c0_i32_0 = arith.constant 0 : i32
    return %arg0, %c0_i32 : i32, i32
  }
}

</mosaic_0001>

<bundles_post_ra>
// kernel: tpu_custom_call.1
= control target key start
LH: loop header
LB: loop body
LE: loop exit
PB: predicated region body
PF: predicated region fallthrough
CT: control target
= control target key end

     0   :  { %12 = vsyncpa [#allocation3], 0  ;;  %s750_s0 = inlined_call_operand.hbm [shape: f32[8,16], index: 0, kind: input, shape index: {}]   ;;  %s751_s1 = inlined_call_operand.vmem [shape: f32[16,128], index: 1, kind: input, shape index: {}]   ;;  %s752_s2 = inlined_call_operand.vmem [shape: f32[1,128], index: 2, kind: input, shape index: {}]   ;;  %s753_s3 = inlined_call_operand.vmem [shape: f32[128,128], index: 3, kind: input, shape index: {}]   ;;  %s754_s4 = inlined_call_operand.vmem [shape: f32[1,128], index: 4, kind: input, shape index: {}]   ;;  %s755_s5 = inlined_call_operand.vmem [shape: f32[128,8], index: 5, kind: input, shape index: {}]   ;;  %s756_s6 = inlined_call_operand.vmem [shape: f32[1,8], index: 6, kind: input, shape index: {}]   ;;  %s757_s7 = inlined_call_operand.hbm [shape: f32[8,8], index: 7, kind: output, shape index: {}]  }
   0x1   :  { %13 = vsyncpa [#allocation4], 0  ;;  %s550_s24 = smov [#allocation2]   ;;  %s502_s28 = scalar_lea.hbm %s750_s0, 128 }
   0x2   :  { %s20_s25 = sshll.u32 %s550_s24, 4  ;;  %p503_p0 = scmp.ne.s32.totalorder %s750_s0, %s502_s28  ;;  %s21_s25 = int_to_ptr.vmem [resolvable:$true] %s20_s25 }
   0x3   :  { %p506_p1 = scmp.lt.u32.totalorder %s502_s28, %s750_s0 }
   0x5   :  { %p508_p2 = pnand %p506_p1, %p503_p0 }
   0x7   :  { %511 = shalt.err (!%p508_p2)
}
   0x8   :  { %s512_s10 = scalar_lea.vmem %s21_s25, 128  ;;  %p517_p4 = scmp.lt.s32.totalorder %s21_s25, %s21_s25 }
   0x9   :  { %p513_p3 = scmp.ne.s32.totalorder %s21_s25, %s512_s10  ;;  %p518_p5 = scmp.lt.s32.totalorder %s512_s10, %s512_s10 }
   0xb   :  { %p519_p6 = por %p518_p5, %p517_p4 }
   0xd   :  { %p520_p7 = pnand %p519_p6, %p513_p3 }
   0xf   :  { %523 = shalt.err (!%p520_p7)
}
  0x10   :  { %23 = dma.hbm_to_vmem [thread:$0]  %s750_s0, 128, %s21_s25, [#allocation3]  }
  0x11   :  { %546 = dma.done.wait [#allocation3], 128  }
  0x12   :  { %547 = vsyncadd [#allocation3], 4294967168  ;;  %v551_v0 = vmov 0.0|0.0   ;;  %vm552_vm0 = vmmov 0   ;;  %v553_v1 = vmov 0.0   ;;  %v40_v2 = vld [vmem:[%s751_s1] sm:$0xff] }
  0x13   :  { %446 = vmatprep.subr.bf16.mxu0 %v551_v0  ;;  %373 = vmatprep.mubr.msk.f32.mxu0 %vm552_vm0, %v553_v1  ;;  %v41_v3 = vld [vmem:[%s751_s1 + $0x8] sm:$0xff]  ;;  %v124_v5 = vld [vmem:[%s753_s3] sm:$0xff]  ;;  %v126_v7 = vld [vmem:[%s753_s3 + $0x10] sm:$0xff]  ;;  %vm49_vm1 = vcmask 130048   ;;  %s554_s9 = smov [#allocation5]   ;;  %vm311_vm2 = vcmask 64512  }
  0x14   :  { %449 = vmatprep.subr.bf16.mxu1 %v551_v0  ;;  %408 = vmatprep.mubr.msk.f32.mxu1 %vm552_vm0, %v553_v1  ;;  %v447_v4 = vpack.c.bf16 %v41_v3, %v40_v2  ;;  %v125_v6 = vld [vmem:[%s753_s3 + $0x8] sm:$0xff]  ;;  %v127_v9 = vld [vmem:[%s753_s3 + $0x18] sm:$0xff]  ;;  %v39_v10 = vld [vmem:[#allocation2] sm:$0xff]  ;;  %s319_s10 = sshll.u32 %s554_s9, 4  ;;  %s320_s10 = int_to_ptr.vmem [resolvable:$true] %s319_s10 }
  0x15   :  { %v450_v8 = vpack.c.bf16 %v125_v6, %v124_v5  ;;  %v453_v11 = vpack.c.bf16 %v127_v9, %v126_v7  ;;  %v128_v12 = vld [vmem:[%s753_s3 + $0x20] sm:$0xff]  ;;  %v129_v13 = vld [vmem:[%s753_s3 + $0x28] sm:$0xff]  ;;  %v130_v15 = vld [vmem:[%s753_s3 + $0x30] sm:$0xff]  ;;  %p529_p9 = scmp.lt.s32.totalorder %s320_s10, %s320_s10 }
  0x16   :  { %448 = vmatpush3.bf16.msra.mxu0 %v447_v4  ;;  %v456_v14 = vpack.c.bf16 %v129_v13, %v128_v12  ;;  %v131_v16 = vld [vmem:[%s753_s3 + $0x38] sm:$0xff]  ;;  %v132_v18 = vld [vmem:[%s753_s3 + $0x40] sm:$0xff]  ;;  %v133_v19 = vld [vmem:[%s753_s3 + $0x48] sm:$0xff] }
  0x17   :  { %451 = vmatpush3.bf16.msra.mxu1 %v450_v8  ;;  %473 = vmatprep.subr.bf16.mxu0 %v551_v0  ;;  %v459_v17 = vpack.c.bf16 %v131_v16, %v130_v15  ;;  %v462_v20 = vpack.c.bf16 %v133_v19, %v132_v18  ;;  %v134_v21 = vld [vmem:[%s753_s3 + $0x50] sm:$0xff]  ;;  %v135_v22 = vld [vmem:[%s753_s3 + $0x58] sm:$0xff]  ;;  %v136_v24 = vld [vmem:[%s753_s3 + $0x60] sm:$0xff] }
  0x18   :  { %452 = vmatprep.subr.bf16.mxu1 %v551_v0  ;;  %v465_v23 = vpack.c.bf16 %v135_v22, %v134_v21  ;;  %v137_v25 = vld [vmem:[%s753_s3 + $0x68] sm:$0xff]  ;;  %v138_v27 = vld [vmem:[%s753_s3 + $0x70] sm:$0xff]  ;;  %v139_v28 = vld [vmem:[%s753_s3 + $0x78] sm:$0xff] }
  0x19   :  { %374 = vmatmul.mubr.msk.f32.vlgmr.msra.gmra.mrb[0].mxu0 %vm49_vm1, %v39_v10  ;;  %v468_v26 = vpack.c.bf16 %v137_v25, %v136_v24  ;;  %v471_v29 = vpack.c.bf16 %v139_v28, %v138_v27  ;;  %v218_v30 = vld [vmem:[%s755_s5] sm:$0xff]  ;;  %v219_v31 = vld [vmem:[%s755_s5 + $0x8] sm:$0xff]  ;;  %v220_v32 = vld [vmem:[%s755_s5 + $0x10] sm:$0xff] }
  0x1a   :  { %443 = vmatprep.mubr.msk.f32.mxu0 %vm552_vm0, %v553_v1  ;;  %v474_v33 = vpack.c.bf16 %v219_v31, %v218_v30  ;;  %v221_v34 = vld [vmem:[%s755_s5 + $0x18] sm:$0xff]  ;;  %v222_v36 = vld [vmem:[%s755_s5 + $0x20] sm:$0xff]  ;;  %v223_v37 = vld [vmem:[%s755_s5 + $0x28] sm:$0xff] }
  0x1b   :  { %454 = vmatpush3.bf16.msra.mxu1 %v453_v11  ;;  %v477_v35 = vpack.c.bf16 %v221_v34, %v220_v32  ;;  %v480_v38 = vpack.c.bf16 %v223_v37, %v222_v36  ;;  %v224_v39 = vld [vmem:[%s755_s5 + $0x30] sm:$0xff]  ;;  %v225_v40 = vld [vmem:[%s755_s5 + $0x38] sm:$0xff]  ;;  %v226_v42 = vld [vmem:[%s755_s5 + $0x40] sm:$0xff] }
  0x1c   :  { %455 = vmatprep.subr.bf16.mxu1 %v551_v0  ;;  %475 = vmatpush3.bf16.msra.mxu0 %v474_v33  ;;  %v483_v41 = vpack.c.bf16 %v225_v40, %v224_v39  ;;  %v227_v43 = vld [vmem:[%s755_s5 + $0x48] sm:$0xff]  ;;  %v228_v45 = vld [vmem:[%s755_s5 + $0x50] sm:$0xff]  ;;  %v229_v46 = vld [vmem:[%s755_s5 + $0x58] sm:$0xff] }
  0x1d   :  { %476 = vmatprep.subr.bf16.mxu0 %v551_v0  ;;  %v486_v44 = vpack.c.bf16 %v227_v43, %v226_v42  ;;  %v489_v47 = vpack.c.bf16 %v229_v46, %v228_v45  ;;  %v230_v48 = vld [vmem:[%s755_s5 + $0x60] sm:$0xff]  ;;  %v231_v49 = vld [vmem:[%s755_s5 + $0x68] sm:$0xff]  ;;  %v232_v56 = vld [vmem:[%s755_s5 + $0x70] sm:$0xff] }
  0x1e   :  { %v492_v50 = vpack.c.bf16 %v231_v49, %v230_v48  ;;  %v328_v51 = vld [vmem:[%s752_s2] ss:$0 sm:$0xff]  ;;  %v233_v57 = vld [vmem:[%s755_s5 + $0x78] sm:$0xff]  ;;  %s524_s5 = scalar_lea.vmem %s320_s10, 128 }
  0x1f   :  { %457 = vmatpush3.bf16.msra.mxu1 %v456_v14  ;;  %v495_v58 = vpack.c.bf16 %v233_v57, %v232_v56  ;;  %v330_v59 = vld [vmem:[%s754_s4] ss:$0 sm:$0xff]  ;;  %p525_p8 = scmp.ne.s32.totalorder %s320_s10, %s524_s5  ;;  %p530_p10 = scmp.lt.s32.totalorder %s524_s5, %s524_s5 }
  0x20   :  { %458 = vmatprep.subr.bf16.mxu1 %v551_v0  ;;  %478 = vmatpush3.bf16.msra.mxu0 %v477_v35 }
  0x21   :  { %479 = vmatprep.subr.bf16.mxu0 %v551_v0  ;;  %p531_p11 = por %p530_p10, %p529_p9 }
  0x23   :  { %460 = vmatpush3.bf16.msra.mxu1 %v459_v17  ;;  %p532_p12 = pnand %p531_p11, %p525_p8 }
  0x24   :  { %461 = vmatprep.subr.bf16.mxu1 %v551_v0  ;;  %481 = vmatpush3.bf16.msra.mxu0 %v480_v38 }
  0x25   :  { %482 = vmatprep.subr.bf16.mxu0 %v551_v0 }
  0x27   :  { %463 = vmatpush3.bf16.msra.mxu1 %v462_v20 }
  0x28   :  { %464 = vmatprep.subr.bf16.mxu1 %v551_v0  ;;  %484 = vmatpush3.bf16.msra.mxu0 %v483_v41 }
  0x29   :  { %485 = vmatprep.subr.bf16.mxu0 %v551_v0 }
  0x2b   :  { %466 = vmatpush3.bf16.msra.mxu1 %v465_v23 }
  0x2c   :  { %467 = vmatprep.subr.bf16.mxu1 %v551_v0  ;;  %487 = vmatpush3.bf16.msra.mxu0 %v486_v44 }
  0x2d   :  { %488 = vmatprep.subr.bf16.mxu0 %v551_v0 }
  0x2f   :  { %469 = vmatpush3.bf16.msra.mxu1 %v468_v26 }
  0x30   :  { %470 = vmatprep.subr.bf16.mxu1 %v551_v0  ;;  %490 = vmatpush3.bf16.msra.mxu0 %v489_v47 }
  0x31   :  { %491 = vmatprep.subr.bf16.mxu0 %v551_v0 }
  0x33   :  { %472 = vmatpush3.bf16.msra.mxu1 %v471_v29 }
  0x34   :  { %493 = vmatpush3.bf16.msra.mxu0 %v492_v50 }
  0x35   :  { %494 = vmatprep.subr.bf16.mxu0 %v551_v0  ;;  %v331_v0 = vld [vmem:[%s756_s6] ss:$0 sm:$0xff] }
  0x38   :  { %496 = vmatpush3.bf16.msra.mxu0 %v495_v58 }
  0xec   :  { %v119_v52 = vpop.f32.mrb[0].mxu0 }
  0xed   :  { %v120_v53 = vadd.f32 %v328_v51, %v119_v52  ;;  %v375_v54 = vpop.f32.mrb[1].mxu0 }
  0xef   :  { %v123_v55 = vmax.f32 %v120_v53, 0.0 }
  0xf1   :  { %409 = vmatmul.mubr.f32.vlgmr.msra.gmra.mrb[0].mxu1 %v123_v55 }
 0x1c4   :  { %v213_v60 = vpop.f32.mrb[0].mxu1 }
 0x1c5   :  { %v214_v61 = vadd.f32 %v330_v59, %v213_v60  ;;  %v410_v62 = vpop.f32.mrb[1].mxu1 }
 0x1c7   :  { %v217_v63 = vmax.f32 %v214_v61, 0.0 }
 0x1c9   :  { %444 = vmatmul.mubr.f32.vlgmr.msra.gmra.mrb[2].mxu0 %v217_v63 }
 0x29c   :  { %v307_v1 = vpop.f32.mrb[2].mxu0 }
 0x29d   :  { %v308_v2 = vadd.f32 %v331_v0, %v307_v1  ;;  %v445_v3 = vpop.f32.mrb[3].mxu0 }
 0x29f   :  { %312 = vst.msk [vmem:[#allocation5] sm:$0xff] %vm311_vm2, %v308_v2 }
 0x2a0   :  { %535 = shalt.err (!%p532_p12)
}
 0x2a1   :  { %s536_s12 = scalar_lea.hbm %s757_s7, 128 }
 0x2a2   :  { %p537_p13 = scmp.ne.s32.totalorder %s757_s7, %s536_s12  ;;  %p540_p0 = scmp.lt.u32.totalorder %s536_s12, %s757_s7 }
 0x2a4   :  { %p542_p1 = pnand %p540_p0, %p537_p13 }
 0x2a6   :  { %545 = shalt.err (!%p542_p1)
}
 0x2a7   :  { %322 = dma.vmem_to_hbm [thread:$0]  %s320_s10, 128, %s757_s7, [#allocation4]  }
 0x2a8   :  { %548 = dma.done.wait [#allocation4], 128  }
 0x2a9   :  { %549 = vsyncadd [#allocation4], 4294967168 }
 0x2aa   :  { %326 = vsyncpa [#allocation3], 1 }
 0x2ab   :  { %327 = vsyncpa [#allocation4], 1 }

</bundles_post_ra>
